<compile_context>
chip_gen: v6e
topology: v6e:2x2x1
jax: 0.10.0
libtpu: 0.0.40
codegen_flags: <defaults>
</compile_context>

<pallas_src>
import functools

import jax
import jax.numpy as jnp
from jax.experimental import pallas as pl
from jax.experimental.pallas import tpu as pltpu

IN_DIM = 147
HIDDEN_DIMS = [256, 128, 64]
OUT_DIM = 1
NEG_SLOPE = 0.2
LN_EPS = 1e-5


def _cdiv(a, b):
    return (a + b - 1) // b


def _round_up(n, m):
    return _cdiv(n, m) * m


def mlp_kernel(x_ref, w0_ref, w1_ref, w2_ref, p_ref, o_ref, *,
               h_dims, residual_01, residual_12):
    """Fused Linear->LayerNorm->LeakyReLU x3 + final dot, one batch tile."""
    d0, d1, d2 = h_dims
    p = p_ref[...]  # (16, pad_cols) f32: packed biases / gammas / betas / w3 / b3

    def block(h_bf16, w_bf16, row, d):
        b    = p[row + 0:row + 1, :d]
        g    = p[row + 1:row + 2, :d]
        beta = p[row + 2:row + 3, :d]
        # bf16 MXU matmul, f32 accumulation; LayerNorm math in f32.
        z = jnp.dot(h_bf16, w_bf16, preferred_element_type=jnp.float32) + b
        mu = jnp.mean(z, axis=-1, keepdims=True)
        ms = jnp.mean(z * z, axis=-1, keepdims=True)          # one-pass stats
        var = jnp.maximum(ms - mu * mu, 0.0)
        zn = (z - mu) * jax.lax.rsqrt(var + LN_EPS) * g + beta
        return jnp.where(zn > 0, zn, NEG_SLOPE * zn)           # LeakyReLU(0.2)

    # x arrives as the raw f32 (tile, 147) tile: cast to bf16 here in VMEM
    # (no wrapper-side pad/cast of the activation), contract over K=147.
    x_bf = x_ref[...].astype(jnp.bfloat16)
    h0 = block(x_bf, w0_ref[...], 0, d0)
    h1 = block(h0.astype(jnp.bfloat16), w1_ref[...], 3, d1)
    if residual_01:   # static shape check, mirrors `x.shape == residual.shape`
        h1 = h1 + h0
    h2 = block(h1.astype(jnp.bfloat16), w2_ref[...], 6, d2)
    if residual_12:
        h2 = h2 + h1

    # Final (d2 -> 1) layer: N=1 matmul is a waste of the MXU; VPU mul +
    # lane reduction in f32 instead.
    w3_row = p[9:10, :d2]     # (1, d2)
    b3 = p[10:11, 0:1]        # (1, 1)
    out = jnp.sum(h2 * w3_row, axis=-1, keepdims=True) + b3
    o_ref[...] = out.astype(o_ref.dtype)


def init_params(key, in_dim=IN_DIM, hidden_dims=HIDDEN_DIMS, out_dim=OUT_DIM):
    """kaiming_normal_(mode='fan_out', nonlinearity='leaky_relu', a=0) =>
    gain=sqrt(2), std=sqrt(2)/sqrt(fan_out); bias=0; LN gamma=1, beta=0.
    Weights stored as (in, out) so the kernel computes h @ W + b directly."""
    dims = [in_dim] + list(hidden_dims) + [out_dim]
    gain = 2.0 ** 0.5
    params = []
    for i in range(len(dims) - 1):
        fan_out = dims[i + 1]
        key, sub = jax.random.split(key)
        std = gain / (fan_out ** 0.5)                      # mode='fan_out'
        w = std * jax.random.normal(sub, (dims[i], fan_out), dtype=jnp.float32)
        b = jnp.zeros((fan_out,), dtype=jnp.float32)
        params.append((w, b))
    ln = [(jnp.ones((h,), jnp.float32), jnp.zeros((h,), jnp.float32))
          for h in hidden_dims]
    return params, ln


def prepare_params(params, ln):
    """One-time (per model) parameter prep: bf16 weight casts + packing of the
    11 small per-feature vectors into one (16, pad_cols) f32 array.  Hoisted
    out of the per-call forward so no per-call XLA prep ops remain."""
    (w0, b0), (w1, b1), (w2, b2), (w3, b3) = params
    (g0, be0), (g1, be1), (g2, be2) = ln

    in_dim = w0.shape[0]
    d0, d1, d2 = w0.shape[1], w1.shape[1], w2.shape[1]
    out_dim = w3.shape[1]
    assert out_dim == 1, "kernel final layer is specialized for out_dim=1"

    pad_cols = _round_up(max(d0, d1, d2, 128), 128)

    def row(v, width):
        r = jnp.zeros((1, pad_cols), jnp.float32)
        return r.at[0, :width].set(v.reshape(-1).astype(jnp.float32))

    packed = jnp.concatenate(
        [row(b0, d0), row(g0, d0), row(be0, d0),
         row(b1, d1), row(g1, d1), row(be1, d1),
         row(b2, d2), row(g2, d2), row(be2, d2),
         row(w3, d2), row(b3, 1),
         jnp.zeros((5, pad_cols), jnp.float32)],   # pad rows -> 16 (multiple of 8)
        axis=0)

    return dict(
        w0=jax.block_until_ready(w0.astype(jnp.bfloat16)),
        w1=jax.block_until_ready(w1.astype(jnp.bfloat16)),
        w2=jax.block_until_ready(w2.astype(jnp.bfloat16)),
        packed=jax.block_until_ready(packed),
        in_dim=in_dim, dims=(d0, d1, d2), out_dim=out_dim, pad_cols=pad_cols,
        residual_01=(d0 == d1), residual_12=(d1 == d2))


def spectral_classifier_forward(x, prepared, *, tile_b=1024):
    in_dim = prepared["in_dim"]
    d0, d1, d2 = prepared["dims"]
    out_dim = prepared["out_dim"]
    pad_cols = prepared["pad_cols"]
    assert x.ndim == 2 and x.shape[1] == in_dim

    batch = x.shape[0]
    # Adaptive batch tile: small batches use small tiles (second-minor block
    # dim only needs a multiple of 8); large batches use tile_b rows.
    tile = min(tile_b, _round_up(max(batch, 1), 8))
    num_tiles = _cdiv(batch, tile)
    if num_tiles > 1 and num_tiles % 2 == 1:
        # v7x megacore: prefer an even number of grid steps across the 2 cores.
        alt = _round_up(_cdiv(batch, num_tiles + 1), 8)
        if _cdiv(batch, alt) % 2 == 0:
            tile = alt
            num_tiles = _cdiv(batch, alt)
    b_pad = num_tiles * tile

    # x goes to the kernel unpadded / un-cast; only pad batch rows when the
    # tile doesn't divide the batch (at most one tile of extra rows).
    if b_pad != batch:
        x_in = jnp.zeros((b_pad, in_dim), x.dtype).at[:batch].set(x)
    else:
        x_in = x

    kernel = functools.partial(
        mlp_kernel, h_dims=(d0, d1, d2),
        residual_01=prepared["residual_01"],
        residual_12=prepared["residual_12"])

    const = lambda i: (0, 0)   # weights/params: same block every grid step
    out = pl.pallas_call(
        kernel,
        out_shape=jax.ShapeDtypeStruct((b_pad, out_dim), jnp.float32),
        grid=(num_tiles,),
        in_specs=[
            pl.BlockSpec((tile, in_dim), lambda i: (i, 0)),   # x tile (double-buffered)
            pl.BlockSpec((in_dim, d0), const),                # W0 (VMEM-resident)
            pl.BlockSpec((d0, d1), const),                    # W1
            pl.BlockSpec((d1, d2), const),                    # W2
            pl.BlockSpec((16, pad_cols), const),              # packed small params
        ],
        out_specs=pl.BlockSpec((tile, out_dim), lambda i: (i, 0)),
        compiler_params=pltpu.CompilerParams(
            dimension_semantics=("parallel",)),
    )(x_in, prepared["w0"], prepared["w1"], prepared["w2"], prepared["packed"])
    return out[:batch]


def reference_forward(x, params, ln):
    """Plain-JAX reference of the PyTorch forward (eval mode), using the same
    bf16-input / f32-accumulate matmul precision as the kernel."""
    (w0, b0), (w1, b1), (w2, b2), (w3, b3) = params
    (g0, be0), (g1, be1), (g2, be2) = ln

    def blk(h, w, b, g, beta):
        z = jnp.dot(h.astype(jnp.bfloat16), w.astype(jnp.bfloat16),
                    preferred_element_type=jnp.float32) + b
        mu = z.mean(-1, keepdims=True)
        var = ((z - mu) ** 2).mean(-1, keepdims=True)
        zn = (z - mu) / jnp.sqrt(var + LN_EPS) * g + beta
        return jnp.where(zn > 0, zn, NEG_SLOPE * zn)

    h = blk(x, w0, b0, g0, be0)
    r = h
    h = blk(h, w1, b1, g1, be1)
    if h.shape == r.shape:
        h = h + r
    r = h
    h = blk(h, w2, b2, g2, be2)
    if h.shape == r.shape:
        h = h + r
    return h @ w3 + b3


if __name__ == "__main__":
    key = jax.random.PRNGKey(0)
    pkey, xkey, xkey2 = jax.random.split(key, 3)

    params, ln = init_params(pkey)
    prepared = prepare_params(params, ln)          # one-time param prep

    # Small batch: adaptive tile (8 rows), single grid step, no padding.
    batch = 8
    x = jax.random.normal(xkey, (batch, IN_DIM), dtype=jnp.float32)
    out = jax.block_until_ready(spectral_classifier_forward(x, prepared))
    ref = reference_forward(x, params, ln)
    assert out.shape == (batch, OUT_DIM), out.shape
    err = float(jnp.max(jnp.abs(out - ref)))
    assert jnp.allclose(out, ref, atol=5e-3, rtol=5e-3), err

    # Multi-tile + batch-padding path (grid > 1) with a small forced tile.
    batch2 = 40
    x2 = jax.random.normal(xkey2, (batch2, IN_DIM), dtype=jnp.float32)
    out2 = jax.block_until_ready(
        spectral_classifier_forward(x2, prepared, tile_b=16))
    ref2 = reference_forward(x2, params, ln)
    assert out2.shape == (batch2, OUT_DIM), out2.shape
    err2 = float(jnp.max(jnp.abs(out2 - ref2)))
    assert jnp.allclose(out2, ref2, atol=5e-3, rtol=5e-3), err2

    print("KERNEL_OK")
</pallas_src>

<mosaic_0001>
module attributes {stable_mosaic.version = 11 : i64} {
  func.func @mlp_kernel(%arg0: i32, %arg1: memref<8x147xf32, #tpu.memory_space<vmem>>, %arg2: memref<147x256xbf16, #tpu.memory_space<vmem>>, %arg3: memref<256x128xbf16, #tpu.memory_space<vmem>>, %arg4: memref<128x64xbf16, #tpu.memory_space<vmem>>, %arg5: memref<16x256xf32, #tpu.memory_space<vmem>>, %arg6: memref<8x1xf32, #tpu.memory_space<vmem>>) attributes {dimension_semantics = [#tpu.dimension_semantics<parallel>], iteration_bounds = array<i64: 1>, scalar_prefetch = 0 : i64, scratch_operands = 0 : i64, tpu.core_type = #tpu.core_type<tc>, window_params = [{transform_indices = @transform_0, window_bounds = array<i64: 8, 147>}, {pipeline_mode = #tpu.pipeline_mode<synchronous>, transform_indices = @transform_1, window_bounds = array<i64: 147, 256>}, {pipeline_mode = #tpu.pipeline_mode<synchronous>, transform_indices = @transform_2, window_bounds = array<i64: 256, 128>}, {pipeline_mode = #tpu.pipeline_mode<synchronous>, transform_indices = @transform_3, window_bounds = array<i64: 128, 64>}, {pipeline_mode = #tpu.pipeline_mode<synchronous>, transform_indices = @transform_4, window_bounds = array<i64: 16, 256>}, {transform_indices = @transform_5, window_bounds = array<i64: 8, 1>}]} {
    %c0 = arith.constant 0 : index
    %c0_0 = arith.constant 0 : index
    %0 = vector.load %arg5[%c0, %c0_0] : memref<16x256xf32, #tpu.memory_space<vmem>>, vector<16x256xf32>
    %c0_1 = arith.constant 0 : index
    %c0_2 = arith.constant 0 : index
    %1 = vector.load %arg1[%c0_1, %c0_2] : memref<8x147xf32, #tpu.memory_space<vmem>>, vector<8x147xf32>
    %2 = arith.truncf %1 : vector<8x147xf32> to vector<8x147xbf16>
    %c0_3 = arith.constant 0 : index
    %c0_4 = arith.constant 0 : index
    %3 = vector.load %arg2[%c0_3, %c0_4] : memref<147x256xbf16, #tpu.memory_space<vmem>>, vector<147x256xbf16>
    %4 = vector.extract_strided_slice %0 {offsets = [0, 0], sizes = [1, 256], strides = [1, 1]} : vector<16x256xf32> to vector<1x256xf32>
    %5 = vector.extract_strided_slice %0 {offsets = [1, 0], sizes = [1, 256], strides = [1, 1]} : vector<16x256xf32> to vector<1x256xf32>
    %6 = vector.extract_strided_slice %0 {offsets = [2, 0], sizes = [1, 256], strides = [1, 1]} : vector<16x256xf32> to vector<1x256xf32>
    %cst = arith.constant dense<0.000000e+00> : vector<8x256xf32>
    %7 = tpu.matmul %2, %3, %cst {dimension_numbers = #tpu.dot_dimension_numbers<[1], [0], [0], [1], [0, 0, 1, 1], [], []>} : vector<8x147xbf16>, vector<147x256xbf16>, vector<8x256xf32> -> vector<8x256xf32>
    %8 = vector.broadcast %4 : vector<1x256xf32> to vector<8x256xf32>
    %9 = arith.addf %7, %8 : vector<8x256xf32>
    %cst_5 = arith.constant dense<0.000000e+00> : vector<8xf32>
    %10 = vector.multi_reduction <add>, %9, %cst_5 [1] : vector<8x256xf32> to vector<8xf32>
    %11 = vector.shape_cast %10 : vector<8xf32> to vector<8x1xf32>
    %cst_6 = arith.constant 2.560000e+02 : f32
    %12 = vector.broadcast %cst_6 : f32 to vector<8x1xf32>
    %13 = arith.divf %11, %12 : vector<8x1xf32>
    %14 = arith.mulf %9, %9 : vector<8x256xf32>
    %cst_7 = arith.constant dense<0.000000e+00> : vector<8xf32>
    %15 = vector.multi_reduction <add>, %14, %cst_7 [1] : vector<8x256xf32> to vector<8xf32>
    %16 = vector.shape_cast %15 : vector<8xf32> to vector<8x1xf32>
    %cst_8 = arith.constant 2.560000e+02 : f32
    %17 = vector.broadcast %cst_8 : f32 to vector<8x1xf32>
    %18 = arith.divf %16, %17 : vector<8x1xf32>
    %19 = arith.mulf %13, %13 : vector<8x1xf32>
    %20 = arith.subf %18, %19 : vector<8x1xf32>
    %cst_9 = arith.constant 0.000000e+00 : f32
    %21 = vector.broadcast %cst_9 : f32 to vector<8x1xf32>
    %22 = arith.maximumf %20, %21 : vector<8x1xf32>
    %23 = vector.broadcast %13 : vector<8x1xf32> to vector<8x256xf32>
    %24 = arith.subf %9, %23 : vector<8x256xf32>
    %cst_10 = arith.constant 9.99999974E-6 : f32
    %25 = vector.broadcast %cst_10 : f32 to vector<8x1xf32>
    %26 = arith.addf %22, %25 : vector<8x1xf32>
    %27 = math.rsqrt %26 : vector<8x1xf32>
    %28 = vector.broadcast %27 : vector<8x1xf32> to vector<8x256xf32>
    %29 = arith.mulf %24, %28 : vector<8x256xf32>
    %30 = vector.broadcast %5 : vector<1x256xf32> to vector<8x256xf32>
    %31 = arith.mulf %29, %30 : vector<8x256xf32>
    %32 = vector.broadcast %6 : vector<1x256xf32> to vector<8x256xf32>
    %33 = arith.addf %31, %32 : vector<8x256xf32>
    %cst_11 = arith.constant 0.000000e+00 : f32
    %34 = vector.broadcast %cst_11 : f32 to vector<8x256xf32>
    %35 = arith.cmpf ogt, %33, %34 : vector<8x256xf32>
    %cst_12 = arith.constant 2.000000e-01 : f32
    %36 = vector.broadcast %cst_12 : f32 to vector<8x256xf32>
    %37 = arith.mulf %36, %33 : vector<8x256xf32>
    %38 = arith.select %35, %33, %37 : vector<8x256xi1>, vector<8x256xf32>
    %39 = arith.truncf %38 : vector<8x256xf32> to vector<8x256xbf16>
    %c0_13 = arith.constant 0 : index
    %c0_14 = arith.constant 0 : index
    %40 = vector.load %arg3[%c0_13, %c0_14] : memref<256x128xbf16, #tpu.memory_space<vmem>>, vector<256x128xbf16>
    %41 = vector.extract_strided_slice %0 {offsets = [3, 0], sizes = [1, 128], strides = [1, 1]} : vector<16x256xf32> to vector<1x128xf32>
    %42 = vector.extract_strided_slice %0 {offsets = [4, 0], sizes = [1, 128], strides = [1, 1]} : vector<16x256xf32> to vector<1x128xf32>
    %43 = vector.extract_strided_slice %0 {offsets = [5, 0], sizes = [1, 128], strides = [1, 1]} : vector<16x256xf32> to vector<1x128xf32>
    %cst_15 = arith.constant dense<0.000000e+00> : vector<8x128xf32>
    %44 = tpu.matmul %39, %40, %cst_15 {dimension_numbers = #tpu.dot_dimension_numbers<[1], [0], [0], [1], [0, 0, 1, 1], [], []>} : vector<8x256xbf16>, vector<256x128xbf16>, vector<8x128xf32> -> vector<8x128xf32>
    %45 = vector.broadcast %41 : vector<1x128xf32> to vector<8x128xf32>
    %46 = arith.addf %44, %45 : vector<8x128xf32>
    %cst_16 = arith.constant dense<0.000000e+00> : vector<8xf32>
    %47 = vector.multi_reduction <add>, %46, %cst_16 [1] : vector<8x128xf32> to vector<8xf32>
    %48 = vector.shape_cast %47 : vector<8xf32> to vector<8x1xf32>
    %cst_17 = arith.constant 1.280000e+02 : f32
    %49 = vector.broadcast %cst_17 : f32 to vector<8x1xf32>
    %50 = arith.divf %48, %49 : vector<8x1xf32>
    %51 = arith.mulf %46, %46 : vector<8x128xf32>
    %cst_18 = arith.constant dense<0.000000e+00> : vector<8xf32>
    %52 = vector.multi_reduction <add>, %51, %cst_18 [1] : vector<8x128xf32> to vector<8xf32>
    %53 = vector.shape_cast %52 : vector<8xf32> to vector<8x1xf32>
    %cst_19 = arith.constant 1.280000e+02 : f32
    %54 = vector.broadcast %cst_19 : f32 to vector<8x1xf32>
    %55 = arith.divf %53, %54 : vector<8x1xf32>
    %56 = arith.mulf %50, %50 : vector<8x1xf32>
    %57 = arith.subf %55, %56 : vector<8x1xf32>
    %cst_20 = arith.constant 0.000000e+00 : f32
    %58 = vector.broadcast %cst_20 : f32 to vector<8x1xf32>
    %59 = arith.maximumf %57, %58 : vector<8x1xf32>
    %60 = vector.broadcast %50 : vector<8x1xf32> to vector<8x128xf32>
    %61 = arith.subf %46, %60 : vector<8x128xf32>
    %cst_21 = arith.constant 9.99999974E-6 : f32
    %62 = vector.broadcast %cst_21 : f32 to vector<8x1xf32>
    %63 = arith.addf %59, %62 : vector<8x1xf32>
    %64 = math.rsqrt %63 : vector<8x1xf32>
    %65 = vector.broadcast %64 : vector<8x1xf32> to vector<8x128xf32>
    %66 = arith.mulf %61, %65 : vector<8x128xf32>
    %67 = vector.broadcast %42 : vector<1x128xf32> to vector<8x128xf32>
    %68 = arith.mulf %66, %67 : vector<8x128xf32>
    %69 = vector.broadcast %43 : vector<1x128xf32> to vector<8x128xf32>
    %70 = arith.addf %68, %69 : vector<8x128xf32>
    %cst_22 = arith.constant 0.000000e+00 : f32
    %71 = vector.broadcast %cst_22 : f32 to vector<8x128xf32>
    %72 = arith.cmpf ogt, %70, %71 : vector<8x128xf32>
    %cst_23 = arith.constant 2.000000e-01 : f32
    %73 = vector.broadcast %cst_23 : f32 to vector<8x128xf32>
    %74 = arith.mulf %73, %70 : vector<8x128xf32>
    %75 = arith.select %72, %70, %74 : vector<8x128xi1>, vector<8x128xf32>
    %76 = arith.truncf %75 : vector<8x128xf32> to vector<8x128xbf16>
    %c0_24 = arith.constant 0 : index
    %c0_25 = arith.constant 0 : index
    %77 = vector.load %arg4[%c0_24, %c0_25] : memref<128x64xbf16, #tpu.memory_space<vmem>>, vector<128x64xbf16>
    %78 = vector.extract_strided_slice %0 {offsets = [6, 0], sizes = [1, 64], strides = [1, 1]} : vector<16x256xf32> to vector<1x64xf32>
    %79 = vector.extract_strided_slice %0 {offsets = [7, 0], sizes = [1, 64], strides = [1, 1]} : vector<16x256xf32> to vector<1x64xf32>
    %80 = vector.extract_strided_slice %0 {offsets = [8, 0], sizes = [1, 64], strides = [1, 1]} : vector<16x256xf32> to vector<1x64xf32>
    %cst_26 = arith.constant dense<0.000000e+00> : vector<8x64xf32>
    %81 = tpu.matmul %76, %77, %cst_26 {dimension_numbers = #tpu.dot_dimension_numbers<[1], [0], [0], [1], [0, 0, 1, 1], [], []>} : vector<8x128xbf16>, vector<128x64xbf16>, vector<8x64xf32> -> vector<8x64xf32>
    %82 = vector.broadcast %78 : vector<1x64xf32> to vector<8x64xf32>
    %83 = arith.addf %81, %82 : vector<8x64xf32>
    %cst_27 = arith.constant dense<0.000000e+00> : vector<8xf32>
    %84 = vector.multi_reduction <add>, %83, %cst_27 [1] : vector<8x64xf32> to vector<8xf32>
    %85 = vector.shape_cast %84 : vector<8xf32> to vector<8x1xf32>
    %cst_28 = arith.constant 6.400000e+01 : f32
    %86 = vector.broadcast %cst_28 : f32 to vector<8x1xf32>
    %87 = arith.divf %85, %86 : vector<8x1xf32>
    %88 = arith.mulf %83, %83 : vector<8x64xf32>
    %cst_29 = arith.constant dense<0.000000e+00> : vector<8xf32>
    %89 = vector.multi_reduction <add>, %88, %cst_29 [1] : vector<8x64xf32> to vector<8xf32>
    %90 = vector.shape_cast %89 : vector<8xf32> to vector<8x1xf32>
    %cst_30 = arith.constant 6.400000e+01 : f32
    %91 = vector.broadcast %cst_30 : f32 to vector<8x1xf32>
    %92 = arith.divf %90, %91 : vector<8x1xf32>
    %93 = arith.mulf %87, %87 : vector<8x1xf32>
    %94 = arith.subf %92, %93 : vector<8x1xf32>
    %cst_31 = arith.constant 0.000000e+00 : f32
    %95 = vector.broadcast %cst_31 : f32 to vector<8x1xf32>
    %96 = arith.maximumf %94, %95 : vector<8x1xf32>
    %97 = vector.broadcast %87 : vector<8x1xf32> to vector<8x64xf32>
    %98 = arith.subf %83, %97 : vector<8x64xf32>
    %cst_32 = arith.constant 9.99999974E-6 : f32
    %99 = vector.broadcast %cst_32 : f32 to vector<8x1xf32>
    %100 = arith.addf %96, %99 : vector<8x1xf32>
    %101 = math.rsqrt %100 : vector<8x1xf32>
    %102 = vector.broadcast %101 : vector<8x1xf32> to vector<8x64xf32>
    %103 = arith.mulf %98, %102 : vector<8x64xf32>
    %104 = vector.broadcast %79 : vector<1x64xf32> to vector<8x64xf32>
    %105 = arith.mulf %103, %104 : vector<8x64xf32>
    %106 = vector.broadcast %80 : vector<1x64xf32> to vector<8x64xf32>
    %107 = arith.addf %105, %106 : vector<8x64xf32>
    %cst_33 = arith.constant 0.000000e+00 : f32
    %108 = vector.broadcast %cst_33 : f32 to vector<8x64xf32>
    %109 = arith.cmpf ogt, %107, %108 : vector<8x64xf32>
    %cst_34 = arith.constant 2.000000e-01 : f32
    %110 = vector.broadcast %cst_34 : f32 to vector<8x64xf32>
    %111 = arith.mulf %110, %107 : vector<8x64xf32>
    %112 = arith.select %109, %107, %111 : vector<8x64xi1>, vector<8x64xf32>
    %113 = vector.extract_strided_slice %0 {offsets = [9, 0], sizes = [1, 64], strides = [1, 1]} : vector<16x256xf32> to vector<1x64xf32>
    %114 = vector.extract_strided_slice %0 {offsets = [10, 0], sizes = [1, 1], strides = [1, 1]} : vector<16x256xf32> to vector<1x1xf32>
    %115 = vector.broadcast %113 : vector<1x64xf32> to vector<8x64xf32>
    %116 = arith.mulf %112, %115 : vector<8x64xf32>
    %cst_35 = arith.constant dense<0.000000e+00> : vector<8xf32>
    %117 = vector.multi_reduction <add>, %116, %cst_35 [1] : vector<8x64xf32> to vector<8xf32>
    %118 = vector.shape_cast %117 : vector<8xf32> to vector<8x1xf32>
    %119 = vector.broadcast %114 : vector<1x1xf32> to vector<8x1xf32>
    %120 = arith.addf %118, %119 : vector<8x1xf32>
    %c0_36 = arith.constant 0 : index
    %c0_37 = arith.constant 0 : index
    %121 = vector.load %arg6[%c0_36, %c0_37] : memref<8x1xf32, #tpu.memory_space<vmem>>, vector<8x1xf32>
    tpu.vector_store %arg6[%c0_36, %c0_37], %120 {strides = array<i32>} : memref<8x1xf32, #tpu.memory_space<vmem>>, vector<8x1xf32>,
    return
  }
  func.func @transform_0(%arg0: i32) -> (i32, i32) {
    %c0_i32 = arith.constant 0 : i32
    %c0_i32_0 = arith.constant 0 : i32
    return %arg0, %c0_i32 : i32, i32
  }
  func.func @transform_1(%arg0: i32) -> (i32, i32) {
    %c0_i32 = arith.constant 0 : i32
    %c0_i32_0 = arith.constant 0 : i32
    %c0_i32_1 = arith.constant 0 : i32
    return %c0_i32, %c0_i32_0 : i32, i32
  }
  func.func @transform_2(%arg0: i32) -> (i32, i32) {
    %c0_i32 = arith.constant 0 : i32
    %c0_i32_0 = arith.constant 0 : i32
    %c0_i32_1 = arith.constant 0 : i32
    return %c0_i32, %c0_i32_0 : i32, i32
  }
  func.func @transform_3(%arg0: i32) -> (i32, i32) {
    %c0_i32 = arith.constant 0 : i32
    %c0_i32_0 = arith.constant 0 : i32
    %c0_i32_1 = arith.constant 0 : i32
    return %c0_i32, %c0_i32_0 : i32, i32
  }
  func.func @transform_4(%arg0: i32) -> (i32, i32) {
    %c0_i32 = arith.constant 0 : i32
    %c0_i32_0 = arith.constant 0 : i32
    %c0_i32_1 = arith.constant 0 : i32
    return %c0_i32, %c0_i32_0 : i32, i32
  }
  func.func @transform_5(%arg0: i32) -> (i32, i32) {
    %c0_i32 = arith.constant 0 : i32
    %c0_i32_0 = arith.constant 0 : i32
    return %arg0, %c0_i32 : i32, i32
  }
}

</mosaic_0001>

<bundles_post_ra>
// kernel: tpu_custom_call.1
= control target key start
LH: loop header
LB: loop body
LE: loop exit
PB: predicated region body
PF: predicated region fallthrough
CT: control target
= control target key end

     0   :  { %10 = vsyncpa [#allocation3], 0  ;;  %s980_s0 = inlined_call_operand.vmem [shape: f32[8,147], index: 0, kind: input, shape index: {}]   ;;  %s981_s1 = inlined_call_operand.hbm [shape: bf16[147,256], index: 1, kind: input, shape index: {}]   ;;  %s982_s2 = inlined_call_operand.hbm [shape: bf16[256,128], index: 2, kind: input, shape index: {}]   ;;  %s983_s3 = inlined_call_operand.vmem [shape: bf16[128,64], index: 3, kind: input, shape index: {}]   ;;  %s984_s4 = inlined_call_operand.vmem [shape: f32[16,256], index: 4, kind: input, shape index: {}]   ;;  %s985_s5 = inlined_call_operand.vmem [shape: f32[8,1], index: 5, kind: output, shape index: {}]  }
   0x1   :  { %11 = vsyncpa [#allocation5], 0  ;;  %s850_s18 = smov [#allocation2]  }
   0x2   :  { %s19_s19 = sshll.u32 %s850_s18, 4  ;;  %s20_s19 = int_to_ptr.vmem [resolvable:$true] %s19_s19 }
   0x3   :  { %s814_s20 = scalar_lea.vmem %s20_s19, 2432  ;;  %p819_p1 = scmp.lt.s32.totalorder %s20_s19, %s20_s19 }
   0x4   :  { %p815_p0 = scmp.ne.s32.totalorder %s20_s19, %s814_s20  ;;  %p820_p2 = scmp.lt.s32.totalorder %s814_s20, %s814_s20 }
   0x6   :  { %p821_p3 = por %p820_p2, %p819_p1 }
   0x8   :  { %p822_p4 = pnand %p821_p3, %p815_p0 }
   0xa   :  { %825 = shalt.err (!%p822_p4)
}
   0xb   :  { %s851_s21 = smov 128   ;;  %s852_s22 = smov 8  }
   0xc   :  { %25 = dma.hbm_to_vmem [thread:$0]  %s981_s1, 2432, %s20_s19, [#allocation3], %s851_s21, %s851_s21, %s852_s22  }
   0xd   :  { %s853_s25 = smov [#allocation4]  }
   0xe   :  { %s31_s26 = sshll.u32 %s853_s25, 4  ;;  %s32_s26 = int_to_ptr.vmem [resolvable:$true] %s31_s26 }
   0xf   :  { %s834_s27 = scalar_lea.vmem %s32_s26, 2048  ;;  %p839_p6 = scmp.lt.s32.totalorder %s32_s26, %s32_s26 }
  0x10   :  { %p835_p5 = scmp.ne.s32.totalorder %s32_s26, %s834_s27  ;;  %p840_p7 = scmp.lt.s32.totalorder %s834_s27, %s834_s27 }
  0x12   :  { %p841_p8 = por %p840_p7, %p839_p6 }
  0x14   :  { %p842_p9 = pnand %p841_p8, %p835_p5 }
  0x16   :  { %845 = shalt.err (!%p842_p9)
}
  0x17   :  { %s854_s28 = smov 64   ;;  %s855_s29 = smov 4  }
  0x18   :  { %37 = dma.hbm_to_vmem [thread:$0]  %s982_s2, 2048, %s32_s26, [#allocation5], %s854_s28, %s854_s28, %s855_s29  }
  0x19   :  { %846 = dma.done.wait [#allocation3], 2432  }
  0x1a   :  { %847 = vsyncadd [#allocation3], 4294964864 }
  0x1b   :  { %848 = dma.done.wait [#allocation5], 2048  }
  0x1c   :  { %849 = vsyncadd [#allocation5], 4294965248  ;;  %v747_v0 = vld [vmem:[#allocation2 + $0x74] ss:$8 sps:$4 sm:$0xff]   ;;  %v749_v1 = vld [vmem:[#allocation2 + $0x70] ss:$8 sps:$4 sm:$0xff]   ;;  %v75_v30 = vlaneseq }
  0x1d   :  { %192 = vmatprep.subr.bf16.mxu0 %v747_v0  ;;  %v750_v2 = vld [vmem:[#allocation2 + $0x64] ss:$8 sps:$4 sm:$0xff]   ;;  %v752_v3 = vld [vmem:[#allocation2 + $0x60] ss:$8 sps:$4 sm:$0xff]   ;;  %v753_v4 = vld [vmem:[#allocation2 + $0x54] ss:$8 sps:$4 sm:$0xff]  }
  0x1e   :  { %193 = vmatpush1.bf16.msra.mxu0 %v749_v1  ;;  %vm182_vm0 = vcmask 1040384   ;;  %v755_v5 = vld [vmem:[#allocation2 + $0x50] ss:$8 sps:$4 sm:$0xff]   ;;  %v756_v6 = vld [vmem:[#allocation2 + $0x44] ss:$8 sps:$4 sm:$0xff]   ;;  %vm183_vm1 = vcmask 1041408  }
  0x1f   :  { %194 = vmatprep.subr.bf16.mxu0 %v750_v2  ;;  %v856_v7 = vmov 65535   ;;  %v758_v9 = vld [vmem:[#allocation2 + $0x40] ss:$8 sps:$4 sm:$0xff]   ;;  %v759_v10 = vld [vmem:[#allocation2 + $0x34] ss:$8 sps:$4 sm:$0xff]   ;;  %vm178_vm2 = vcmask 154624  }
  0x20   :  { %v184_v8 = vsel %vm182_vm0, 4294967295, %v856_v7  ;;  %v53_v12 = vld [vmem:[%s980_s0 + $0x8] sm:$0xff]  ;;  %v761_v13 = vld [vmem:[#allocation2 + $0x30] ss:$8 sps:$4 sm:$0xff]   ;;  %v765_v17 = vld [vmem:[#allocation2 + $0x14] ss:$8 sps:$4 sm:$0xff]  }
  0x21   :  { %v185_v11 = vsel %vm183_vm1, %v184_v8, 0  ;;  %v55_v14 = vpack.c.bf16 %v53_v12, %v53_v12  ;;  %v762_v15 = vld [vmem:[#allocation2 + $0x24] ss:$8 sps:$4 sm:$0xff]   ;;  %v764_v16 = vld [vmem:[#allocation2 + $0x20] ss:$8 sps:$4 sm:$0xff]   ;;  %v901_v31 = vshrl.u32 %v75_v30, 7 }
  0x22   :  { %195 = vmatpush1.bf16.msra.mxu0 %v752_v3  ;;  %v74_v18 = vld [vmem:[#allocation2 + $0x90] sm:$0x33]  ;;  %v768_v20 = vld [vmem:[#allocation2 + $0x4] ss:$8 sps:$4 sm:$0xff]   ;;  %v770_v22 = vld [vmem:[#allocation2] ss:$8 sps:$4 sm:$0xff]  }
  0x23   :  { %196 = vmatprep.subr.bf16.mxu0 %v753_v4  ;;  %662 = vmatprep.mubr.msk.bf16.mxu0 %vm178_vm2, %v55_v14  ;;  %v767_v19 = vld [vmem:[#allocation2 + $0x10] ss:$8 sps:$4 sm:$0xff]   ;;  %v661_v21 = vcombine.high %v74_v18, %v74_v18  ;;  %v660_v23 = vcombine.low %v74_v18, %v74_v18  ;;  %v773_v26 = vld [vmem:[#allocation2 + $0x84] ss:$8 sps:$4 sm:$0xff]   ;;  %v775_v27 = vld [vmem:[#allocation2 + $0x80] ss:$8 sps:$4 sm:$0xff]  }
  0x24   :  { %v52_v28 = vld [vmem:[%s980_s0] sm:$0xff]  ;;  %v904_v32 = vsub.s32 0, %v901_v31  ;;  %v914_v34 = vld [vmem:[%s984_s4 + $0x8] sm:$0xff]  ;;  %v776_v47 = vld [vmem:[#allocation4 + $0x78] sm:$0xff]   ;;  %v921_v7 = vsub.s32 1, %v901_v31  ;;  %v924_v8 = vsub.s32 2, %v901_v31 }
  0x25   :  { %v190_v24 = vand.u32 %v661_v21, %v185_v11  ;;  %v187_v25 = vand.u32 %v660_v23, %v185_v11  ;;  %v54_v29 = vpack.c.bf16 %v52_v28, %v52_v28  ;;  %v909_v33 = vld [vmem:[%s984_s4] sm:$0xff]  ;;  %v777_v48 = vld [vmem:[#allocation4 + $0x38] sm:$0xff]   ;;  %687 = vmatprep.subr.bf16.mxu1 %v776_v47  ;;  %v778_v49 = vld [vmem:[#allocation4 + $0x70] sm:$0xff]   ;;  %v315_v28 = vsub.s32 3, %v901_v31 }
  0x26   :  { %197 = vmatpush1.bf16.msra.mxu0 %v755_v5  ;;  %v78_v35 = vrot.slane %v909_v33, %v904_v32  ;;  %v82_v36 = vrot.slane %v914_v34, %v904_v32  ;;  %688 = vmatpush3.bf16.msra.mxu1 %v777_v48  ;;  %v779_v50 = vld [vmem:[#allocation4 + $0x30] sm:$0xff]   ;;  %v780_v51 = vld [vmem:[#allocation4 + $0x68] sm:$0xff]   ;;  %v782_v53 = vld [vmem:[#allocation4 + $0x60] sm:$0xff]   ;;  %v256_v12 = vrot.slane %v909_v33, %v921_v7  ;;  %vm858_vm5 = vmmov 0  }
  0x27   :  { %198 = vmatprep.subr.bf16.mxu0 %v756_v6  ;;  %689 = vmatprep.subr.bf16.mxu1 %v778_v49  ;;  %v781_v52 = vld [vmem:[#allocation4 + $0x28] sm:$0xff]   ;;  %v783_v54 = vld [vmem:[#allocation4 + $0x20] sm:$0xff]   ;;  %v784_v55 = vld [vmem:[#allocation4 + $0x58] sm:$0xff]   ;;  %v316_v30 = vrot.slane %v909_v33, %v315_v28  ;;  %vm590_vm7 = vcmask 523264   ;;  %vm634_vm9 = vcmask 7168  }
  0x28   :  { %v785_v56 = vld [vmem:[#allocation4 + $0x18] sm:$0xff]   ;;  %v786_v57 = vld [vmem:[#allocation4 + $0x50] sm:$0xff]   ;;  %v788_v59 = vld [vmem:[#allocation4 + $0x48] sm:$0xff]  }
  0x29   :  { %v787_v58 = vld [vmem:[#allocation4 + $0x10] sm:$0xff]   ;;  %v789_v60 = vld [vmem:[#allocation4 + $0x8] sm:$0xff]   ;;  %v790_v61 = vld [vmem:[#allocation4 + $0x40] sm:$0xff]  }
  0x2a   :  { %199 = vmatpush1.bf16.msra.mxu0 %v758_v9  ;;  %690 = vmatpush3.bf16.msra.mxu1 %v779_v50  ;;  %v791_v62 = vld [vmem:[#allocation4] sm:$0xff]   ;;  %v260_v9 = vrot.slane %v914_v34, %v921_v7  ;;  %v798_v47 = vld [vmem:[%s983_s3 + $0x8] sm:$0xff]   ;;  %v799_v48 = vld [vmem:[%s983_s3] sm:$0xff]  }
  0x2b   :  { %200 = vmatprep.subr.bf16.mxu0 %v759_v10  ;;  %691 = vmatprep.subr.bf16.mxu1 %v780_v51 }
  0x2e   :  { %201 = vmatpush1.bf16.msra.mxu0 %v761_v13  ;;  %692 = vmatpush3.bf16.msra.mxu1 %v781_v52 }
  0x2f   :  { %202 = vmatprep.subr.bf16.mxu0 %v762_v15  ;;  %693 = vmatprep.subr.bf16.mxu1 %v782_v53  ;;  %v270_v15 = vrot.slane %v914_v34, %v924_v8 }
  0x32   :  { %203 = vmatpush1.bf16.msra.mxu0 %v764_v16  ;;  %694 = vmatpush3.bf16.msra.mxu1 %v783_v54 }
  0x33   :  { %204 = vmatprep.subr.bf16.mxu0 %v765_v17  ;;  %695 = vmatprep.subr.bf16.mxu1 %v784_v55  ;;  %v266_v17 = vrot.slane %v909_v33, %v924_v8 }
  0x36   :  { %205 = vmatpush1.bf16.msra.mxu0 %v767_v19  ;;  %696 = vmatpush3.bf16.msra.mxu1 %v785_v56 }
  0x37   :  { %206 = vmatprep.subr.bf16.mxu0 %v768_v20  ;;  %697 = vmatprep.subr.bf16.mxu1 %v786_v57  ;;  %v470_v57 = vsub.s32 4, %v901_v31 }
  0x3a   :  { %207 = vmatpush1.bf16.msra.mxu0 %v770_v22  ;;  %698 = vmatpush3.bf16.msra.mxu1 %v787_v58  ;;  %v475_v58 = vsub.s32 5, %v901_v31 }
  0x3b   :  { %220 = vmatprep.subr.bf16.mxu0 %v190_v24  ;;  %699 = vmatprep.subr.bf16.mxu1 %v788_v59 }
  0x3e   :  { %221 = vmatpush2.bf16.msra.mxu0 %v187_v25  ;;  %700 = vmatpush3.bf16.msra.mxu1 %v789_v60  ;;  %v471_v60 = vrot.slane %v909_v33, %v470_v57 }
  0x3f   :  { %222 = vmatprep.subr.bf16.mxu0 %v773_v26  ;;  %701 = vmatprep.subr.bf16.mxu1 %v790_v61 }
  0x42   :  { %223 = vmatpush2.bf16.msra.mxu0 %v775_v27  ;;  %702 = vmatpush3.bf16.msra.mxu1 %v791_v62 }
  0x45   :  { %225 = vmatmul.mubr.bf16.vlgmr.msra.gmra.mxu0 %v54_v29 }
 0x105   :  { %v226_v37 = vpop.f32.mrf.mxu0 }
 0x106   :  { %v227_v39 = vadd.f32 %v226_v37, %v78_v35 }
 0x107   :  { %v228_v38 = vpop.f32.mrf.mxu0 }
 0x108   :  { %v229_v40 = vadd.f32 %v228_v38, %v82_v36  ;;  %v238_v45 = vmul.f32 %v227_v39, %v227_v39 }
 0x109   :  { %v230_v41 = vpop.f32.mrf.mxu0 }
 0x10a   :  { %v233_v42 = vadd.f32 %v229_v40, %v227_v39  ;;  %v239_v43 = vmul.f32 %v229_v40, %v229_v40  ;;  %v857_v41 = vmov 0.0  }
 0x10b   :  { %v231_v44 = vpop.f32.mrf.mxu0  ;;  %718 = vmatprep.subr.bf16.mxu1 %v857_v41 }
 0x10c   :  { %234 = vadd.xlane.f32.xlu0 %v233_v42  ;;  %v240_v46 = vadd.f32 %v239_v43, %v238_v45  ;;  %v793_v42 = vld [vmem:[%s983_s3 + $0x30] sm:$0xff]   ;;  %v794_v43 = vld [vmem:[%s983_s3 + $0x28] sm:$0xff]   ;;  %v795_v44 = vld [vmem:[%s983_s3 + $0x20] sm:$0xff]  }
 0x10d   :  { %v796_v45 = vld [vmem:[%s983_s3 + $0x18] sm:$0xff]  }
 0x110   :  { %241 = vadd.xlane.f32.xlu0 %v240_v46  ;;  %v797_v46 = vld [vmem:[%s983_s3 + $0x10] sm:$0xff]  }
 0x195   :  { %v235_v63 = vpop.xlane.xlu0 %234 }
 0x196   :  { %v237_v0 = vmul.f32 0.00390625, %v235_v63  ;;  %v476_v63 = vrot.slane %v909_v33, %v475_v58 }
 0x198   :  { %v244_v2 = vmul.f32 %v237_v0, %v237_v0  ;;  %v247_v10 = vsub.f32 %v227_v39, %v237_v0  ;;  %v248_v11 = vsub.f32 %v229_v40, %v237_v0  ;;  %v792_v40 = vld [vmem:[%s983_s3 + $0x38] sm:$0xff]  }
 0x199   :  { %v242_v1 = vpop.xlane.xlu0 %241 }
 0x19a   :  { %v243_v3 = vmul.f32 0.00390625, %v242_v1 }
 0x19c   :  { %v245_v4 = vsub.f32 %v243_v3, %v244_v2 }
 0x19e   :  { %v246_v5 = vmax.f32 %v245_v4, 0.0 }
 0x1a0   :  { %v249_v6 = vadd.f32 1e-05, %v246_v5  ;;  %v500_v5 = vsub.s32 6, %v901_v31 }
 0x1a2   :  { %800 = vrsqrt.f32 %v249_v6  ;;  %v501_v6 = vrot.slane %v909_v33, %v500_v5 }
 0x1af   :  { %v801_v13 = vpop.eup %800 }
 0x1b0   :  { %v252_v14 = vmul.f32 %v801_v13, %v248_v11  ;;  %v251_v16 = vmul.f32 %v801_v13, %v247_v10 }
 0x1b2   :  { %v262_v18 = vmul.f32 %v260_v9, %v252_v14  ;;  %v261_v19 = vmul.f32 %v256_v12, %v251_v16 }
 0x1b4   :  { %v272_v20 = vadd.f32 %v270_v15, %v262_v18  ;;  %v271_v21 = vadd.f32 %v266_v17, %v261_v19 }
 0x1b6   :  { %vm274_vm3 = vcmp.gt.f32.partialorder %v272_v20, 0.0  ;;  %v276_v22 = vmul.f32 0.2, %v272_v20  ;;  %vm273_vm4 = vcmp.gt.f32.partialorder %v271_v21, 0.0  ;;  %v275_v23 = vmul.f32 0.2, %v271_v21 }
 0x1b8   :  { %v278_v24 = vsel %vm274_vm3, %v272_v20, %v276_v22  ;;  %v277_v25 = vsel %vm273_vm4, %v271_v21, %v275_v23 }
 0x1b9   :  { %v280_v26 = vpack.c.bf16 %v278_v24, %v278_v24  ;;  %v279_v27 = vpack.c.bf16 %v277_v25, %v277_v25  ;;  %v610_v25 = vsub.s32 7, %v901_v31 }
 0x1bb   :  { %445 = vmatprep.mubr.bf16.mxu1 %v280_v26  ;;  %v51_v26 = vld [vmem:[%s984_s4 + $0x10] sm:$0xff]  ;;  %v611_v28 = vrot.slane %v909_v33, %v610_v25 }
 0x1bc   :  { %446 = vmatmul.mubr.bf16.vlgmr.msra.gmra.mxu1 %v279_v27 }
 0x1bd   :  { %719 = vmatpush3.bf16.msra.mxu1 %v792_v40  ;;  %734 = vmatprep.mubr.msk.bf16.mxu1 %vm858_vm5, %v857_v41 }
 0x1be   :  { %720 = vmatprep.subr.bf16.mxu1 %v857_v41 }
 0x1c1   :  { %721 = vmatpush3.bf16.msra.mxu1 %v793_v42 }
 0x1c2   :  { %722 = vmatprep.subr.bf16.mxu1 %v857_v41 }
 0x1c5   :  { %723 = vmatpush3.bf16.msra.mxu1 %v794_v43 }
 0x1c6   :  { %724 = vmatprep.subr.bf16.mxu1 %v857_v41 }
 0x1c9   :  { %725 = vmatpush3.bf16.msra.mxu1 %v795_v44 }
 0x1ca   :  { %726 = vmatprep.subr.bf16.mxu1 %v857_v41 }
 0x1cd   :  { %727 = vmatpush3.bf16.msra.mxu1 %v796_v45 }
 0x1ce   :  { %728 = vmatprep.subr.bf16.mxu1 %v857_v41 }
 0x1d1   :  { %729 = vmatpush3.bf16.msra.mxu1 %v797_v46 }
 0x1d2   :  { %730 = vmatprep.subr.bf16.mxu1 %v857_v41 }
 0x1d5   :  { %731 = vmatpush3.bf16.msra.mxu1 %v798_v47 }
 0x1d6   :  { %732 = vmatprep.subr.bf16.mxu1 %v857_v41  ;;  %v632_v41 = vrot.slane %v51_v26, %v924_v8 }
 0x1d9   :  { %733 = vmatpush3.bf16.msra.mxu1 %v799_v48 }
 0x27c   :  { %v703_v29 = vpop.f32.mrf.mxu1 }
 0x27e   :  { %v704_v34 = vpop.f32.mrf.mxu1 }
 0x27f   :  { %v705_v35 = vadd.f32 %v704_v34, %v703_v29  ;;  %v616_v34 = vrot.slane %v51_v26, %v904_v32 }
 0x280   :  { %v706_v36 = vpop.f32.mrf.mxu1 }
 0x281   :  { %v448_v37 = vadd.f32 %v705_v35, %v316_v30 }
 0x282   :  { %v707_v38 = vpop.f32.mrf.mxu1 }
 0x283   :  { %453 = vadd.xlane.f32.xlu1 %v448_v37  ;;  %v457_v39 = vmul.f32 %v448_v37, %v448_v37 }
 0x287   :  { %458 = vadd.xlane.f32.xlu1 %v457_v39 }
 0x30c   :  { %v454_v49 = vpop.xlane.xlu1 %453 }
 0x30d   :  { %v456_v50 = vmul.f32 0.0078125, %v454_v49 }
 0x30f   :  { %v461_v52 = vmul.f32 %v456_v50, %v456_v50  ;;  %v464_v59 = vsub.f32 %v448_v37, %v456_v50  ;;  %v624_v37 = vrot.slane %v51_v26, %v921_v7 }
 0x310   :  { %v459_v51 = vpop.xlane.xlu1 %458 }
 0x311   :  { %v460_v53 = vmul.f32 0.0078125, %v459_v51 }
 0x313   :  { %v462_v54 = vsub.f32 %v460_v53, %v461_v52 }
 0x315   :  { %v463_v55 = vmax.f32 %v462_v54, 0.0 }
 0x317   :  { %v465_v56 = vadd.f32 1e-05, %v463_v55 }
 0x319   :  { %802 = vrsqrt.f32 %v465_v56 }
 0x326   :  { %v803_v61 = vpop.eup %802 }
 0x327   :  { %v467_v62 = vmul.f32 %v803_v61, %v464_v59 }
 0x329   :  { %v472_v0 = vmul.f32 %v471_v60, %v467_v62 }
 0x32b   :  { %v477_v1 = vadd.f32 %v476_v63, %v472_v0 }
 0x32d   :  { %vm478_vm6 = vcmp.gt.f32.partialorder %v477_v1, 0.0  ;;  %v479_v2 = vmul.f32 0.2, %v477_v1 }
 0x32f   :  { %v480_v3 = vsel %vm478_vm6, %v477_v1, %v479_v2 }
 0x330   :  { %v481_v4 = vpack.c.bf16 %v480_v3, %v480_v3 }
 0x332   :  { %735 = vmatmul.mubr.bf16.vlgmr.msra.gmra.mxu1 %v481_v4 }
 0x3f2   :  { %v584_v9 = vpop.f32.mrf.mxu1 }
 0x3f3   :  { %v585_v10 = vadd.f32 %v584_v9, %v501_v6 }
 0x3f4   :  { %v736_v11 = vpop.f32.mrf.mxu1 }
 0x3f5   :  { %v591_v12 = vsel %vm590_vm7, %v585_v10, 0.0  ;;  %v596_v13 = vmul.f32 %v585_v10, %v585_v10 }
 0x3f6   :  { %592 = vadd.xlane.f32.xlu0 %v591_v12  ;;  %v587_v14 = vpop.f32.mrf.mxu1 }
 0x3f7   :  { %v597_v15 = vsel %vm590_vm7, %v596_v13, 0.0 }
 0x3f8   :  { %598 = vadd.xlane.f32.xlu1 %v597_v15  ;;  %v737_v16 = vpop.f32.mrf.mxu1 }
 0x47f   :  { %v593_v17 = vpop.xlane.xlu0 %592 }
 0x480   :  { %v595_v18 = vmul.f32 0.015625, %v593_v17 }
 0x481   :  { %v599_v19 = vpop.xlane.xlu1 %598 }
 0x482   :  { %v601_v20 = vmul.f32 %v595_v18, %v595_v18  ;;  %v600_v21 = vmul.f32 0.015625, %v599_v19  ;;  %v604_v27 = vsub.f32 %v585_v10, %v595_v18 }
 0x484   :  { %v602_v22 = vsub.f32 %v600_v21, %v601_v20 }
 0x486   :  { %v603_v23 = vmax.f32 %v602_v22, 0.0 }
 0x488   :  { %v605_v24 = vadd.f32 1e-05, %v603_v23 }
 0x48a   :  { %804 = vrsqrt.f32 %v605_v24 }
 0x497   :  { %v805_v29 = vpop.eup %804 }
 0x498   :  { %v607_v30 = vmul.f32 %v805_v29, %v604_v27 }
 0x49a   :  { %v612_v35 = vmul.f32 %v611_v28, %v607_v30 }
 0x49c   :  { %v617_v36 = vadd.f32 %v616_v34, %v612_v35 }
 0x49e   :  { %vm618_vm8 = vcmp.gt.f32.partialorder %v617_v36, 0.0  ;;  %v619_v38 = vmul.f32 0.2, %v617_v36 }
 0x4a0   :  { %v620_v39 = vsel %vm618_vm8, %v617_v36, %v619_v38 }
 0x4a1   :  { %v625_v40 = vmul.f32 %v624_v37, %v620_v39 }
 0x4a3   :  { %v626_v31 = vsel %vm590_vm7, %v625_v40, 0.0 }
 0x4a4   :  { %627 = vadd.xlane.f32.xlu0 %v626_v31 }
 0x52d   :  { %v628_v42 = vpop.xlane.xlu0 %627 }
 0x52e   :  { %v633_v33 = vadd.f32 %v632_v41, %v628_v42 }
 0x530   :  { %635 = vst.msk [vmem:[%s985_s5] sm:$0xff] %vm634_vm9, %v633_v33 }
 0x531   :  { %640 = vsyncpa [#allocation3], 1 }
 0x532   :  { %641 = vsyncpa [#allocation5], 1 }

</bundles_post_ra>
